<compile_context>
chip_gen: v5e
topology: v5e:2x2
jax: 0.10.0
libtpu: 0.0.40
codegen_flags: <defaults>
</compile_context>

<pallas_src>
import jax
import jax.numpy as jnp
import numpy as np
from jax.experimental import pallas as pl
from jax.experimental.pallas import tpu as pltpu


def _round_up(a, b):
    return (a + b - 1) // b * b


def _cdiv(a, b):
    return (a + b - 1) // b


def sm_cnn_kernel(x_ref, wt_ref, bc_ref, wh_ref, bh_ref, out_ref):
    """One batch tile of the fused SM_CNN forward.

    x_ref  : VMEM (bn, C_in*T)      flattened input tile (native dtype)
    wt_ref : VMEM (C_in*T, CHL_pad) Toeplitz conv weights (f32, lane-padded)
    bc_ref : VMEM (1, CHL_pad)      conv bias broadcast row
    wh_ref : VMEM (CHL_pad, H)      pool-folded head weights
    bh_ref : VMEM (1, H)            ones-column bias row of out_weight
    out_ref: VMEM (bn, H)           prediction tile
    """
    x = x_ref[...].astype(jnp.float32)                                  # (bn, CinT)

    # Conv1d for all channels as a single MXU matmul against the banded weight.
    z = jnp.dot(x, wt_ref[...], preferred_element_type=jnp.float32)     # (bn, CHL_pad)
    z = z + bc_ref[...]

    # sigmoid: exp goes to the EUP; exact divide keeps full accuracy (the
    # approximate reciprocal saving is negligible for an HBM-bound kernel).
    s = 1.0 / (1.0 + jnp.exp(-z))

    # Head: pool-folded weights + bias row.  Padded CHL columns hold
    # sigmoid(0)=0.5 but multiply zero weight rows, so they contribute nothing.
    pred = jnp.dot(s, wh_ref[...], preferred_element_type=jnp.float32)  # (bn, H)
    out_ref[...] = (pred + bh_ref[...]).astype(out_ref.dtype)


def sm_cnn_forward(x, conv_w, conv_b, out_w, *, n_tile_max=1024):
    """pred = [1, concat_ch(avgpool3(sigmoid(conv1d_ch(x))))] @ out_w."""
    N, C_in, T = x.shape
    CH, _, K = conv_w.shape
    L = T - K + 1                  # conv output length (padding=0)
    Lp = L - 2                     # after AvgPool1d(kernel=3, stride=1)
    H = out_w.shape[1]
    assert out_w.shape[0] == 1 + CH * Lp

    CinT = C_in * T
    CHL = CH * L
    CHL_pad = _round_up(CHL, 128)  # lane-dense MXU intermediate (VMEM only)

    # ---- Toeplitz / im2col conv weights: W[c*T + l + k, ch*L + l] = w[ch,c,k].
    ch_i, c_i, k_i, l_i = np.meshgrid(
        np.arange(CH), np.arange(C_in), np.arange(K), np.arange(L), indexing="ij")
    rows = (c_i * T + l_i + k_i).ravel()
    cols = (ch_i * L + l_i).ravel()
    vals = conv_w.astype(jnp.float32)[ch_i.ravel(), c_i.ravel(), k_i.ravel()]
    w_toe = jnp.zeros((CinT, CHL_pad), jnp.float32).at[rows, cols].add(vals)

    # ---- Conv bias as a broadcast row (padded columns stay zero).
    bias_conv = jnp.zeros((1, CHL_pad), jnp.float32)
    bias_conv = bias_conv.at[0, :CHL].set(jnp.repeat(conv_b.astype(jnp.float32), L))

    # ---- Fold the (linear) average pool into the head weights: per channel,
    # pool(s) @ W  ==  s @ W'  with  W'[l] = (W[l] + W[l-1] + W[l-2]) / 3,
    # W taken as zero outside [0, Lp).  Ones-column bias row kept separate.
    out_w = out_w.astype(jnp.float32)
    bias_head = out_w[0:1, :]                                    # (1, H)
    w_blk = out_w[1:, :].reshape(CH, Lp, H)
    z1 = jnp.zeros((CH, 1, H), jnp.float32)
    z2 = jnp.zeros((CH, 2, H), jnp.float32)
    w_folded = (jnp.concatenate([w_blk, z2], axis=1)
                + jnp.concatenate([z1, w_blk, z1], axis=1)
                + jnp.concatenate([z2, w_blk], axis=1)) / 3.0    # (CH, L, H)
    w_head = jnp.zeros((CHL_pad, H), jnp.float32)
    w_head = w_head.at[:CHL, :].set(w_folded.reshape(CHL, H))

    # ---- Flatten x to 2D (metadata-only reshape); keep its native dtype.
    x2d = x.reshape(N, CinT)

    # ---- Balanced batch tiles; even step count when >1 tile (v7x megacore).
    num_tiles = max(1, _cdiv(N, n_tile_max))
    if num_tiles > 1 and num_tiles % 2 != 0:
        num_tiles += 1
    n_tile = _round_up(_cdiv(N, num_tiles), 8)
    N_pad = n_tile * num_tiles
    if N_pad != N:
        x2d = jnp.pad(x2d, ((0, N_pad - N), (0, 0)))

    out = pl.pallas_call(
        sm_cnn_kernel,
        out_shape=jax.ShapeDtypeStruct((N_pad, H), jnp.float32),
        grid=(num_tiles,),
        in_specs=[
            pl.BlockSpec((n_tile, CinT), lambda i: (i, 0)),      # x batch tile
            pl.BlockSpec((CinT, CHL_pad), lambda i: (0, 0)),     # Toeplitz conv W
            pl.BlockSpec((1, CHL_pad), lambda i: (0, 0)),        # conv bias row
            pl.BlockSpec((CHL_pad, H), lambda i: (0, 0)),        # pool-folded head W
            pl.BlockSpec((1, H), lambda i: (0, 0)),              # head bias row
        ],
        out_specs=pl.BlockSpec((n_tile, H), lambda i: (i, 0)),
        compiler_params=pltpu.CompilerParams(
            dimension_semantics=("parallel",)),
    )(x2d, w_toe, bias_conv, w_head, bias_head)

    return out if N_pad == N else out[:N]


def sm_cnn_reference(x, conv_w, conv_b, out_w):
    """Pure-JAX reference mirroring the PyTorch forward pass."""
    N, C_in, T = x.shape
    CH, _, K = conv_w.shape
    L = T - K + 1
    Lp = L - 2
    x = x.astype(jnp.float32)
    fms = []
    for ch in range(CH):
        conv = jnp.zeros((N, L), jnp.float32)
        for c in range(C_in):
            for k in range(K):
                conv = conv + x[:, c, k:k + L] * conv_w[ch, c, k]
        conv = conv + conv_b[ch]
        s = jax.nn.sigmoid(conv)
        p = (s[:, 0:Lp] + s[:, 1:Lp + 1] + s[:, 2:Lp + 2]) / 3.0
        fms.append(p)
    fm = jnp.concatenate(fms, axis=1)
    c_state = jnp.concatenate([jnp.ones((N, 1), jnp.float32), fm], axis=1)
    return c_state @ out_w.astype(jnp.float32)


if __name__ == "__main__":
    # Small shapes consistent with the module: batch N, In_channels, Timesteps,
    # Kernel_size, number of learned channels CH, output horizon H.
    N, C_in, T = 8, 4, 16
    K, CH, H = 3, 2, 4
    L = T - K + 1
    Lp = L - 2

    key = jax.random.PRNGKey(0)
    k_x, k_w, k_b, k_o = jax.random.split(key, 4)

    x = jax.random.normal(k_x, (N, C_in, T), dtype=jnp.float32)
    # Deterministic synthetic parameters (matching __init__ uniform(-0.25, 0.25)
    # for conv weights/biases; out_weight would normally come from lstsq).
    conv_w = jax.random.uniform(k_w, (CH, C_in, K), jnp.float32, -0.25, 0.25)
    conv_b = jax.random.uniform(k_b, (CH,), jnp.float32, -0.25, 0.25)
    out_w = 0.1 * jax.random.normal(k_o, (1 + CH * Lp, H), dtype=jnp.float32)

    pred = sm_cnn_forward(x, conv_w, conv_b, out_w)
    pred = jax.block_until_ready(pred)

    ref = sm_cnn_reference(x, conv_w, conv_b, out_w)
    assert pred.shape == (N, H)
    assert jnp.allclose(pred, ref, rtol=1e-4, atol=1e-4), (
        f"max abs diff {jnp.max(jnp.abs(pred - ref))}"
    )
    print("KERNEL_OK")
</pallas_src>

<mosaic_0001>
module attributes {stable_mosaic.version = 11 : i64} {
  func.func @sm_cnn_kernel(%arg0: i32, %arg1: memref<8x64xf32, #tpu.memory_space<vmem>>, %arg2: memref<64x128xf32, #tpu.memory_space<vmem>>, %arg3: memref<1x128xf32, #tpu.memory_space<vmem>>, %arg4: memref<128x4xf32, #tpu.memory_space<vmem>>, %arg5: memref<1x4xf32, #tpu.memory_space<vmem>>, %arg6: memref<8x4xf32, #tpu.memory_space<vmem>>) attributes {dimension_semantics = [#tpu.dimension_semantics<parallel>], iteration_bounds = array<i64: 1>, scalar_prefetch = 0 : i64, scratch_operands = 0 : i64, tpu.core_type = #tpu.core_type<tc>, window_params = [{transform_indices = @transform_0, window_bounds = array<i64: 8, 64>}, {pipeline_mode = #tpu.pipeline_mode<synchronous>, transform_indices = @transform_1, window_bounds = array<i64: 64, 128>}, {pipeline_mode = #tpu.pipeline_mode<synchronous>, transform_indices = @transform_2, window_bounds = array<i64: 1, 128>}, {pipeline_mode = #tpu.pipeline_mode<synchronous>, transform_indices = @transform_3, window_bounds = array<i64: 128, 4>}, {pipeline_mode = #tpu.pipeline_mode<synchronous>, transform_indices = @transform_4, window_bounds = array<i64: 1, 4>}, {transform_indices = @transform_5, window_bounds = array<i64: 8, 4>}]} {
    %c0 = arith.constant 0 : index
    %c0_0 = arith.constant 0 : index
    %0 = vector.load %arg1[%c0, %c0_0] : memref<8x64xf32, #tpu.memory_space<vmem>>, vector<8x64xf32>
    %c0_1 = arith.constant 0 : index
    %c0_2 = arith.constant 0 : index
    %1 = vector.load %arg2[%c0_1, %c0_2] : memref<64x128xf32, #tpu.memory_space<vmem>>, vector<64x128xf32>
    %cst = arith.constant dense<0.000000e+00> : vector<8x128xf32>
    %2 = tpu.matmul %0, %1, %cst {dimension_numbers = #tpu.dot_dimension_numbers<[1], [0], [0], [1], [0, 0, 1, 1], [], []>} : vector<8x64xf32>, vector<64x128xf32>, vector<8x128xf32> -> vector<8x128xf32>
    %c0_3 = arith.constant 0 : index
    %c0_4 = arith.constant 0 : index
    %3 = vector.load %arg3[%c0_3, %c0_4] : memref<1x128xf32, #tpu.memory_space<vmem>>, vector<1x128xf32>
    %4 = vector.broadcast %3 : vector<1x128xf32> to vector<8x128xf32>
    %5 = arith.addf %2, %4 : vector<8x128xf32>
    %cst_5 = arith.constant 0.000000e+00 : f32
    %6 = vector.broadcast %cst_5 : f32 to vector<8x128xf32>
    %7 = arith.subf %6, %5 : vector<8x128xf32>
    %8 = math.exp %7 : vector<8x128xf32>
    %cst_6 = arith.constant 1.000000e+00 : f32
    %9 = vector.broadcast %cst_6 : f32 to vector<8x128xf32>
    %10 = arith.addf %9, %8 : vector<8x128xf32>
    %cst_7 = arith.constant 1.000000e+00 : f32
    %11 = vector.broadcast %cst_7 : f32 to vector<8x128xf32>
    %12 = arith.divf %11, %10 : vector<8x128xf32>
    %c0_8 = arith.constant 0 : index
    %c0_9 = arith.constant 0 : index
    %13 = vector.load %arg4[%c0_8, %c0_9] : memref<128x4xf32, #tpu.memory_space<vmem>>, vector<128x4xf32>
    %cst_10 = arith.constant dense<0.000000e+00> : vector<8x4xf32>
    %14 = tpu.matmul %12, %13, %cst_10 {dimension_numbers = #tpu.dot_dimension_numbers<[1], [0], [0], [1], [0, 0, 1, 1], [], []>} : vector<8x128xf32>, vector<128x4xf32>, vector<8x4xf32> -> vector<8x4xf32>
    %c0_11 = arith.constant 0 : index
    %c0_12 = arith.constant 0 : index
    %15 = vector.load %arg5[%c0_11, %c0_12] : memref<1x4xf32, #tpu.memory_space<vmem>>, vector<1x4xf32>
    %16 = vector.broadcast %15 : vector<1x4xf32> to vector<8x4xf32>
    %17 = arith.addf %14, %16 : vector<8x4xf32>
    %c0_13 = arith.constant 0 : index
    %c0_14 = arith.constant 0 : index
    %18 = vector.load %arg6[%c0_13, %c0_14] : memref<8x4xf32, #tpu.memory_space<vmem>>, vector<8x4xf32>
    tpu.vector_store %arg6[%c0_13, %c0_14], %17 {strides = array<i32>} : memref<8x4xf32, #tpu.memory_space<vmem>>, vector<8x4xf32>,
    return
  }
  func.func @transform_0(%arg0: i32) -> (i32, i32) {
    %c0_i32 = arith.constant 0 : i32
    %c0_i32_0 = arith.constant 0 : i32
    return %arg0, %c0_i32 : i32, i32
  }
  func.func @transform_1(%arg0: i32) -> (i32, i32) {
    %c0_i32 = arith.constant 0 : i32
    %c0_i32_0 = arith.constant 0 : i32
    %c0_i32_1 = arith.constant 0 : i32
    return %c0_i32, %c0_i32_0 : i32, i32
  }
  func.func @transform_2(%arg0: i32) -> (i32, i32) {
    %c0_i32 = arith.constant 0 : i32
    %c0_i32_0 = arith.constant 0 : i32
    %c0_i32_1 = arith.constant 0 : i32
    return %c0_i32, %c0_i32_0 : i32, i32
  }
  func.func @transform_3(%arg0: i32) -> (i32, i32) {
    %c0_i32 = arith.constant 0 : i32
    %c0_i32_0 = arith.constant 0 : i32
    %c0_i32_1 = arith.constant 0 : i32
    return %c0_i32, %c0_i32_0 : i32, i32
  }
  func.func @transform_4(%arg0: i32) -> (i32, i32) {
    %c0_i32 = arith.constant 0 : i32
    %c0_i32_0 = arith.constant 0 : i32
    %c0_i32_1 = arith.constant 0 : i32
    return %c0_i32, %c0_i32_0 : i32, i32
  }
  func.func @transform_5(%arg0: i32) -> (i32, i32) {
    %c0_i32 = arith.constant 0 : i32
    %c0_i32_0 = arith.constant 0 : i32
    return %arg0, %c0_i32 : i32, i32
  }
}

</mosaic_0001>

<bundles_post_ra>
// kernel: tpu_custom_call.1
= control target key start
LH: loop header
LB: loop body
LE: loop exit
PB: predicated region body
PF: predicated region fallthrough
CT: control target
= control target key end

     0   :  { %vm33_vm0 = vcmask 523264   ;;  %vm116_vm5 = vcmask 31744   ;;  %s243_s1 = inlined_call_operand.vmem [shape: f32[64,128], index: 1, kind: input, shape index: {}]   ;;  %s244_s2 = inlined_call_operand.vmem [shape: f32[1,128], index: 2, kind: input, shape index: {}]   ;;  %s245_s0 = inlined_call_operand.vmem [shape: f32[8,64], index: 0, kind: input, shape index: {}]   ;;  %s246_s4 = inlined_call_operand.vmem [shape: f32[1,4], index: 4, kind: input, shape index: {}]   ;;  %s247_s3 = inlined_call_operand.vmem [shape: f32[128,4], index: 3, kind: input, shape index: {}]   ;;  %s248_s5 = inlined_call_operand.vmem [shape: f32[8,4], index: 5, kind: output, shape index: {}]  }
   0x1   :  { %v28_v0 = vld [vmem:[%s243_s1 + $0x38] sm:$0xff]  ;;  %v27_v1 = vld [vmem:[%s243_s1 + $0x30] sm:$0xff]  ;;  %v26_v2 = vld [vmem:[%s243_s1 + $0x28] sm:$0xff] }
   0x2   :  { %45 = vmatpush.msra.mxu0 %v28_v0  ;;  %v25_v3 = vld [vmem:[%s243_s1 + $0x20] sm:$0xff]  ;;  %v24_v4 = vld [vmem:[%s243_s1 + $0x18] sm:$0xff]  ;;  %v23_v5 = vld [vmem:[%s243_s1 + $0x10] sm:$0xff] }
   0x3   :  { %v22_v6 = vld [vmem:[%s243_s1 + $0x8] sm:$0xff]  ;;  %v21_v7 = vld [vmem:[%s243_s1] sm:$0xff]  ;;  %v91_v9 = vld [vmem:[%s247_s3 + $0x78] sm:$0xff] }
   0x4   :  { %46 = vmatpush.msra.mxu0 %v27_v1  ;;  %v20_v8 = vld [vmem:[%s245_s0] sm:$0xff]  ;;  %96 = vmatpush.msra.mxu1 %v91_v9  ;;  %v90_v10 = vld [vmem:[%s247_s3 + $0x70] sm:$0xff]  ;;  %v89_v11 = vld [vmem:[%s247_s3 + $0x68] sm:$0xff] }
   0x5   :  { %v88_v12 = vld [vmem:[%s247_s3 + $0x60] sm:$0xff]  ;;  %v87_v13 = vld [vmem:[%s247_s3 + $0x58] sm:$0xff]  ;;  %v86_v14 = vld [vmem:[%s247_s3 + $0x50] sm:$0xff] }
   0x6   :  { %47 = vmatpush.msra.mxu0 %v26_v2  ;;  %97 = vmatpush.msra.mxu1 %v90_v10  ;;  %v85_v15 = vld [vmem:[%s247_s3 + $0x48] sm:$0xff]  ;;  %v84_v16 = vld [vmem:[%s247_s3 + $0x40] sm:$0xff]  ;;  %v83_v17 = vld [vmem:[%s247_s3 + $0x38] sm:$0xff] }
   0x7   :  { %v82_v18 = vld [vmem:[%s247_s3 + $0x30] sm:$0xff]  ;;  %v81_v19 = vld [vmem:[%s247_s3 + $0x28] sm:$0xff]  ;;  %v80_v20 = vld [vmem:[%s247_s3 + $0x20] sm:$0xff] }
   0x8   :  { %48 = vmatpush.msra.mxu0 %v25_v3  ;;  %98 = vmatpush.msra.mxu1 %v89_v11  ;;  %v79_v21 = vld [vmem:[%s247_s3 + $0x18] sm:$0xff]  ;;  %v78_v22 = vld [vmem:[%s247_s3 + $0x10] sm:$0xff]  ;;  %v77_v23 = vld [vmem:[%s247_s3 + $0x8] sm:$0xff] }
   0x9   :  { %v123_v24 = vld [vmem:[%s244_s2] ss:$0 sm:$0xff] }
   0xa   :  { %49 = vmatpush.msra.mxu0 %v24_v4  ;;  %99 = vmatpush.msra.mxu1 %v88_v12  ;;  %v76_v25 = vld [vmem:[%s247_s3] sm:$0xff] }
   0xb   :  { %v124_v42 = vld [vmem:[%s246_s4] ss:$0 sm:$0xff] }
   0xc   :  { %50 = vmatpush.msra.mxu0 %v23_v5  ;;  %100 = vmatpush.msra.mxu1 %v87_v13 }
   0xe   :  { %51 = vmatpush.msra.mxu0 %v22_v6  ;;  %101 = vmatpush.msra.mxu1 %v86_v14 }
  0x10   :  { %52 = vmatpush.msra.mxu0 %v21_v7  ;;  %102 = vmatpush.msra.mxu1 %v85_v15 }
  0x11   :  { %122 = vmatmul.msk.f32.vlgmr.msra.gmra.mxu0 %vm33_vm0, %v20_v8 }
  0x12   :  { %103 = vmatpush.msra.mxu1 %v84_v16 }
  0x14   :  { %104 = vmatpush.msra.mxu1 %v83_v17 }
  0x16   :  { %105 = vmatpush.msra.mxu1 %v82_v18 }
  0x18   :  { %106 = vmatpush.msra.mxu1 %v81_v19 }
  0x1a   :  { %107 = vmatpush.msra.mxu1 %v80_v20 }
  0x1c   :  { %108 = vmatpush.msra.mxu1 %v79_v21 }
  0x1e   :  { %109 = vmatpush.msra.mxu1 %v78_v22 }
  0x20   :  { %110 = vmatpush.msra.mxu1 %v77_v23 }
  0x22   :  { %111 = vmatpush.msra.mxu1 %v76_v25 }
  0x8e   :  { %v54_v26 = vpop.f32.mrf.mxu0 }
  0x8f   :  { %v55_v27 = vadd.f32 %v123_v24, %v54_v26 }
  0x91   :  { %v57_v28 = vsub.f32 0.0, %v55_v27 }
  0x93   :  { %v58_v29 = vmul.f32 1.442695, %v57_v28 }
  0x95   :  { %125 = vpow2.f32 %v58_v29 }
  0x9b   :  { %v126_v30 = vpop.eup %125 }
  0x9c   :  { %v60_v31 = vadd.f32 1.0, %v126_v30 }
  0x9e   :  { %127 = vrcp.f32 %v60_v31  ;;  %v72_v35 = vand.u32 2147483648, %v60_v31  ;;  %v70_v37 = vand.u32 2147483647, %v60_v31  ;;  %vm66_vm2 = vweird.f32 %v60_v31 }
  0xa0   :  { %v73_v39 = vor.u32 1.1754944e-38, %v72_v35  ;;  %vm71_vm4 = vcmp.eq.f32.partialorder %v70_v37, 8.507059e+37 }
  0xa4   :  { %v128_v32 = vpop.eup %127 }
  0xa5   :  { %v62_v33 = vmul.f32 %v128_v32, %v60_v31  ;;  %vm67_vm1 = vweird.f32 %v128_v32 }
  0xa6   :  { %vm68_vm3 = vmor %vm66_vm2, %vm67_vm1 }
  0xa7   :  { %v63_v34 = vsub.f32 1.0, %v62_v33 }
  0xa9   :  { %v64_v36 = vmul.f32 %v128_v32, %v63_v34 }
  0xab   :  { %v65_v38 = vadd.f32 %v128_v32, %v64_v36 }
  0xad   :  { %v69_v40 = vsel %vm68_vm3, %v128_v32, %v65_v38 }
  0xae   :  { %v74_v41 = vsel %vm71_vm4, %v73_v39, %v69_v40 }
  0xaf   :  { %112 = vmatmul.f32.vlgmr.msra.gmra.mxu1 %v74_v41 }
 0x12c   :  { %v113_v43 = vpop.f32.mrf.mxu1 }
 0x12d   :  { %v114_v44 = vadd.f32 %v124_v42, %v113_v43 }
 0x12f   :  { %117 = vst.msk [vmem:[%s248_s5] sm:$0xff] %vm116_vm5, %v114_v44 }

</bundles_post_ra>
